<compile_context>
chip_gen: v6e
topology: v6e:2x2x1
jax: 0.10.0
libtpu: 0.0.40
codegen_flags: <defaults>
</compile_context>

<pallas_src>
import functools
import math

import jax
import jax.numpy as jnp
from jax.experimental import pallas as pl
from jax.experimental.pallas import tpu as pltpu

PERTURBATION_LEVELS = [40, 30, 20, 10, 0]  # SNR in dB


def _round_up(x, m):
    return (x + m - 1) // m * m


def _add_noise_kernel(x_ref, d_ref, o_ref, *, inv_snr_scale):
    """One (row_tile, L) tile: row-wise energy reduction + scaled add."""
    x = x_ref[...].astype(jnp.float32)                      # (TR, L)
    d = d_ref[...].astype(jnp.float32)                      # (TR, L)

    e_sig = jnp.sum(x * x, axis=-1, keepdims=True)          # (TR, 1)  XLU lane-reduce
    e_noise = jnp.sum(d * d, axis=-1, keepdims=True)        # (TR, 1)

    # 10 ** ((10*log10(e_sig/e_noise) - snr_db) / 20)
    #   == sqrt(e_sig / e_noise) * 10**(-snr_db / 20)
    # (snr_db is a compile-time constant folded into inv_snr_scale)
    scale = jnp.sqrt(e_sig / e_noise) * inv_snr_scale       # (TR, 1)

    o_ref[...] = (x + scale * d).astype(o_ref.dtype)


def gaussian_noise_forward(x, noise, perturbation_level, *,
                           per_stream_vmem_bytes=1 << 20):
    """Pallas implementation of GaussianNoise.forward.

    x, noise: same shape (..., L). L (the waveform/time axis) maps to the TPU
    lane axis; all leading dims are flattened into rows on the sublane axis.
    """
    assert x.shape == noise.shape
    snr_db = float(PERTURBATION_LEVELS[perturbation_level])
    inv_snr_scale = 10.0 ** (-snr_db / 20.0)

    lead = x.shape[:-1]
    L = x.shape[-1]
    R = math.prod(lead) if lead else 1

    x2 = x.reshape(R, L)
    d2 = noise.reshape(R, L)

    # --- tile sizing (bandwidth-bound: biggest tile within scoped VMEM) -----
    itemsize = jnp.dtype(x.dtype).itemsize
    sub_mult = 8 * max(1, 4 // itemsize)        # 8 for f32, 16 for bf16, 32 for i8
    R_pad_full = _round_up(R, sub_mult)

    # ~per_stream_vmem_bytes per BlockSpec buffer (x, d, out are each double
    # buffered by the pipeline); floor to the sublane multiple.
    row_tile = max(sub_mult,
                   (per_stream_vmem_bytes // (L * itemsize)) // sub_mult * sub_mult)
    row_tile = min(row_tile, R_pad_full)
    # Keep >= 2 grid steps when possible so v7x's 2 TensorCores both get work.
    if R_pad_full >= 2 * sub_mult:
        row_tile = min(row_tile, _round_up(pl.cdiv(R_pad_full, 2), sub_mult))

    num_tiles = pl.cdiv(R, row_tile)
    R_pad = num_tiles * row_tile
    if R_pad != R:
        # Pad the ragged tail instead of shrinking the tile; padded rows are
        # sliced off below (noise padded with 1s keeps e_noise > 0 / finite).
        x2 = jnp.pad(x2, ((0, R_pad - R), (0, 0)))
        d2 = jnp.pad(d2, ((0, R_pad - R), (0, 0)), constant_values=1.0)

    kernel = functools.partial(_add_noise_kernel, inv_snr_scale=inv_snr_scale)

    out = pl.pallas_call(
        kernel,
        out_shape=jax.ShapeDtypeStruct((R_pad, L), x.dtype),
        grid_spec=pl.GridSpec(
            grid=(num_tiles,),
            in_specs=[
                pl.BlockSpec((row_tile, L), lambda i: (i, 0)),
                pl.BlockSpec((row_tile, L), lambda i: (i, 0)),
            ],
            out_specs=pl.BlockSpec((row_tile, L), lambda i: (i, 0)),
        ),
        compiler_params=pltpu.CompilerParams(
            dimension_semantics=("parallel",),
            vmem_limit_bytes=32 * 1024 * 1024,
        ),
    )(x2, d2)

    if R_pad != R:
        out = out[:R]
    return out.reshape(x.shape)


def _reference(x, noise, perturbation_level):
    """Pure-JAX reference (mirrors torchaudio.functional.add_noise)."""
    snr_db = float(PERTURBATION_LEVELS[perturbation_level])
    x32 = x.astype(jnp.float32)
    d32 = noise.astype(jnp.float32)
    e_sig = jnp.sum(x32 * x32, axis=-1, keepdims=True)
    e_noise = jnp.sum(d32 * d32, axis=-1, keepdims=True)
    orig_snr_db = 10.0 * (jnp.log10(e_sig) - jnp.log10(e_noise))
    scale = 10.0 ** ((orig_snr_db - snr_db) / 20.0)
    return (x32 + scale * d32).astype(x.dtype)


if __name__ == "__main__":
    key = jax.random.PRNGKey(0)
    kx, kd = jax.random.split(key)

    # batch=2, channels=4, waveform length=256 (last axis == time axis)
    x = jax.random.normal(kx, (2, 4, 256), dtype=jnp.float32)
    # torch uses a nondeterministically-seeded generator; we draw the N(0,1)
    # noise deterministically from PRNGKey(0) instead.
    d = jax.random.normal(kd, (2, 4, 256), dtype=jnp.float32)

    perturbation_level = 2  # -> 20 dB SNR

    out = gaussian_noise_forward(x, d, perturbation_level)
    out = jax.block_until_ready(out)

    ref = _reference(x, d, perturbation_level)
    assert out.shape == x.shape and out.dtype == x.dtype
    assert jnp.allclose(out, ref, rtol=1e-5, atol=1e-5), "mismatch vs reference"

    # quick check of the ragged-tail / larger-batch path (R=3*5=15, not a
    # multiple of the 8-row sublane tile)
    xb = jax.random.normal(kx, (3, 5, 384), dtype=jnp.float32)
    db = jax.random.normal(kd, (3, 5, 384), dtype=jnp.float32)
    outb = jax.block_until_ready(gaussian_noise_forward(xb, db, 0))
    assert jnp.allclose(outb, _reference(xb, db, 0), rtol=1e-5, atol=1e-5)

    print("KERNEL_OK")
</pallas_src>

<mosaic_0001>
module attributes {stable_mosaic.version = 11 : i64} {
  func.func @_add_noise_kernel(%arg0: i32, %arg1: memref<8x256xf32, #tpu.memory_space<vmem>>, %arg2: memref<8x256xf32, #tpu.memory_space<vmem>>, %arg3: memref<8x256xf32, #tpu.memory_space<vmem>>) attributes {dimension_semantics = [#tpu.dimension_semantics<parallel>], iteration_bounds = array<i64: 1>, scalar_prefetch = 0 : i64, scratch_operands = 0 : i64, tpu.core_type = #tpu.core_type<tc>, window_params = [{transform_indices = @transform_0, window_bounds = array<i64: 8, 256>}, {transform_indices = @transform_1, window_bounds = array<i64: 8, 256>}, {transform_indices = @transform_2, window_bounds = array<i64: 8, 256>}]} {
    %c0 = arith.constant 0 : index
    %c0_0 = arith.constant 0 : index
    %0 = vector.load %arg1[%c0, %c0_0] : memref<8x256xf32, #tpu.memory_space<vmem>>, vector<8x256xf32>
    %c0_1 = arith.constant 0 : index
    %c0_2 = arith.constant 0 : index
    %1 = vector.load %arg2[%c0_1, %c0_2] : memref<8x256xf32, #tpu.memory_space<vmem>>, vector<8x256xf32>
    %2 = arith.mulf %0, %0 : vector<8x256xf32>
    %cst = arith.constant dense<0.000000e+00> : vector<8xf32>
    %3 = vector.multi_reduction <add>, %2, %cst [1] : vector<8x256xf32> to vector<8xf32>
    %4 = vector.shape_cast %3 : vector<8xf32> to vector<8x1xf32>
    %5 = arith.mulf %1, %1 : vector<8x256xf32>
    %cst_3 = arith.constant dense<0.000000e+00> : vector<8xf32>
    %6 = vector.multi_reduction <add>, %5, %cst_3 [1] : vector<8x256xf32> to vector<8xf32>
    %7 = vector.shape_cast %6 : vector<8xf32> to vector<8x1xf32>
    %8 = arith.divf %4, %7 : vector<8x1xf32>
    %9 = math.sqrt %8 : vector<8x1xf32>
    %cst_4 = arith.constant 1.000000e-01 : f32
    %10 = vector.broadcast %cst_4 : f32 to vector<8x1xf32>
    %11 = arith.mulf %9, %10 : vector<8x1xf32>
    %12 = vector.broadcast %11 : vector<8x1xf32> to vector<8x256xf32>
    %13 = arith.mulf %12, %1 : vector<8x256xf32>
    %14 = arith.addf %0, %13 : vector<8x256xf32>
    %c0_5 = arith.constant 0 : index
    %c0_6 = arith.constant 0 : index
    %15 = vector.load %arg3[%c0_5, %c0_6] : memref<8x256xf32, #tpu.memory_space<vmem>>, vector<8x256xf32>
    tpu.vector_store %arg3[%c0_5, %c0_6], %14 {strides = array<i32>} : memref<8x256xf32, #tpu.memory_space<vmem>>, vector<8x256xf32>,
    return
  }
  func.func @transform_0(%arg0: i32) -> (i32, i32) {
    %c0_i32 = arith.constant 0 : i32
    %c0_i32_0 = arith.constant 0 : i32
    return %arg0, %c0_i32 : i32, i32
  }
  func.func @transform_1(%arg0: i32) -> (i32, i32) {
    %c0_i32 = arith.constant 0 : i32
    %c0_i32_0 = arith.constant 0 : i32
    return %arg0, %c0_i32 : i32, i32
  }
  func.func @transform_2(%arg0: i32) -> (i32, i32) {
    %c0_i32 = arith.constant 0 : i32
    %c0_i32_0 = arith.constant 0 : i32
    return %arg0, %c0_i32 : i32, i32
  }
}

</mosaic_0001>

<bundles_post_ra>
// kernel: tpu_custom_call.1
= control target key start
LH: loop header
LB: loop body
LE: loop exit
PB: predicated region body
PF: predicated region fallthrough
CT: control target
= control target key end

     0   :  { %7 = vsyncpa [#allocation3], 0  ;;  %s182_s0 = inlined_call_operand.hbm [shape: f32[8,256], index: 0, kind: input, shape index: {}]   ;;  %s183_s1 = inlined_call_operand.hbm [shape: f32[8,256], index: 1, kind: input, shape index: {}]   ;;  %s184_s2 = inlined_call_operand.hbm [shape: f32[8,256], index: 2, kind: output, shape index: {}]  }
   0x1   :  { %8 = vsyncpa [#allocation6], 0 }
   0x2   :  { %9 = vsyncpa [#allocation4], 0  ;;  %s155_s9 = smov [#allocation2]   ;;  %s156_s11 = smov [#allocation5]  }
   0x3   :  { %s16_s10 = sshll.u32 %s155_s9, 4  ;;  %s26_s12 = sshll.u32 %s156_s11, 4  ;;  %s17_s10 = int_to_ptr.vmem [resolvable:$true] %s16_s10  ;;  %s27_s12 = int_to_ptr.vmem [resolvable:$true] %s26_s12 }
   0x4   :  { %s97_s13 = scalar_lea.vmem %s17_s10, 256  ;;  %p102_p1 = scmp.lt.s32.totalorder %s17_s10, %s17_s10 }
   0x5   :  { %p98_p0 = scmp.ne.s32.totalorder %s17_s10, %s97_s13  ;;  %p103_p2 = scmp.lt.s32.totalorder %s97_s13, %s97_s13 }
   0x7   :  { %p104_p3 = por %p103_p2, %p102_p1 }
   0x9   :  { %p105_p4 = pnand %p104_p3, %p98_p0 }
   0xb   :  { %108 = shalt.err (!%p105_p4)
}
   0xc   :  { %19 = dma.hbm_to_vmem [thread:$0]  %s182_s0, 256, %s17_s10, [#allocation3]  }
   0xd   :  { %s117_s16 = scalar_lea.vmem %s27_s12, 256  ;;  %p122_p6 = scmp.lt.s32.totalorder %s27_s12, %s27_s12 }
   0xe   :  { %p118_p5 = scmp.ne.s32.totalorder %s27_s12, %s117_s16  ;;  %p123_p7 = scmp.lt.s32.totalorder %s117_s16, %s117_s16 }
  0x10   :  { %p124_p8 = por %p123_p7, %p122_p6 }
  0x12   :  { %p125_p9 = pnand %p124_p8, %p118_p5 }
  0x14   :  { %128 = shalt.err (!%p125_p9)
}
  0x15   :  { %29 = dma.hbm_to_vmem [thread:$0]  %s183_s1, 256, %s27_s12, [#allocation6]  }
  0x16   :  { %149 = dma.done.wait [#allocation3], 256  }
  0x17   :  { %150 = vsyncadd [#allocation3], 4294967040 }
  0x18   :  { %151 = dma.done.wait [#allocation6], 256  }
  0x19   :  { %152 = vsyncadd [#allocation6], 4294967040  ;;  %v38_v0 = vld [vmem:[#allocation5] sm:$0xff]  ;;  %v39_v1 = vld [vmem:[#allocation5 + $0x8] sm:$0xff]  ;;  %s157_s0 = smov [#allocation7]  }
  0x1a   :  { %v36_v2 = vld [vmem:[#allocation2] sm:$0xff]  ;;  %v45_v3 = vmul.f32 %v38_v0, %v38_v0  ;;  %v46_v4 = vmul.f32 %v39_v1, %v39_v1  ;;  %v37_v5 = vld [vmem:[#allocation2 + $0x8] sm:$0xff]  ;;  %s72_s1 = sshll.u32 %s157_s0, 4  ;;  %s73_s1 = int_to_ptr.vmem [resolvable:$true] %s72_s1 }
  0x1b   :  { %v40_v6 = vmul.f32 %v36_v2, %v36_v2  ;;  %v41_v7 = vmul.f32 %v37_v5, %v37_v5  ;;  %s129_s19 = scalar_lea.vmem %s73_s1, 256  ;;  %p134_p11 = scmp.lt.s32.totalorder %s73_s1, %s73_s1 }
  0x1c   :  { %v47_v8 = vadd.f32 %v46_v4, %v45_v3  ;;  %p130_p10 = scmp.ne.s32.totalorder %s73_s1, %s129_s19  ;;  %p135_p12 = scmp.lt.s32.totalorder %s129_s19, %s129_s19 }
  0x1d   :  { %v42_v9 = vadd.f32 %v41_v7, %v40_v6 }
  0x1e   :  { %48 = vadd.xlane.f32.xlu0 %v47_v8  ;;  %p136_p13 = por %p135_p12, %p134_p11 }
  0x20   :  { %p137_p0 = pnand %p136_p13, %p130_p10 }
  0x22   :  { %43 = vadd.xlane.f32.xlu0 %v42_v9 }
  0xa7   :  { %v49_v10 = vpop.xlane.xlu0 %48 }
  0xa8   :  { %85 = vrcp.f32 %v49_v10 }
  0xab   :  { %v44_v11 = vpop.xlane.xlu0 %43 }
  0xb5   :  { %v86_v12 = vpop.eup %85 }
  0xb6   :  { %v51_v13 = vmul.f32 %v86_v12, %v44_v11 }
  0xb8   :  { %87 = vrsqrt.f32 %v51_v13  ;;  %vm54_vm0 = vcmp.eq.f32.partialorder %v51_v13, inf  ;;  %v57_v16 = vand.u32 2147483648, %v51_v13  ;;  %vm56_vm1 = vcmp.eq.f32.partialorder %v51_v13, 0.0 }
  0xc5   :  { %v88_v14 = vpop.eup %87 }
  0xc6   :  { %v53_v15 = vmul.f32 %v88_v14, %v51_v13 }
  0xc8   :  { %v55_v17 = vsel %vm54_vm0, %v51_v13, %v53_v15 }
  0xc9   :  { %v58_v18 = vsel %vm56_vm1, %v57_v16, %v55_v17 }
  0xca   :  { %v59_v19 = vmul.f32 0.1, %v58_v18 }
  0xcc   :  { %v60_v20 = vmul.f32 %v59_v19, %v38_v0  ;;  %v61_v21 = vmul.f32 %v59_v19, %v39_v1 }
  0xce   :  { %v62_v22 = vadd.f32 %v60_v20, %v36_v2  ;;  %v63_v23 = vadd.f32 %v61_v21, %v37_v5 }
  0xd0   :  { %64 = vst [vmem:[#allocation7] sm:$0xff] %v62_v22  ;;  %65 = vst [vmem:[#allocation7 + $0x8] sm:$0xff] %v63_v23 }
  0xd1   :  { %140 = shalt.err (!%p137_p0)
}
  0xd2   :  { %75 = dma.vmem_to_hbm [thread:$0]  %s73_s1, 256, %s184_s2, [#allocation4]  }
  0xd3   :  { %153 = dma.done.wait [#allocation4], 256  }
  0xd4   :  { %154 = vsyncadd [#allocation4], 4294967040 }
  0xd5   :  { %79 = vsyncpa [#allocation3], 1 }
  0xd6   :  { %80 = vsyncpa [#allocation6], 1 }
  0xd7   :  { %81 = vsyncpa [#allocation4], 1 }

</bundles_post_ra>
